<compile_context>
chip_gen: v5e
topology: v5e:2x2
jax: 0.10.0
libtpu: 0.0.40
codegen_flags: <defaults>
</compile_context>

<pallas_src>
import jax
import jax.numpy as jnp
from jax.experimental import pallas as pl
from jax.experimental.pallas import tpu as pltpu


# ----------------------------------------------------------------------------- kernel body

def _sdf_to_density_kernel(scal_ref, sdf_ref, out_ref):
    # scal_ref: SMEM (2,) scalar prefetch = (-1/beta, 0.5/beta)
    # sdf_ref / out_ref: VMEM tiles of shape (tm, W)
    neg_inv_beta = scal_ref[0]
    half_inv_beta = scal_ref[1]
    sdf = sdf_ref[...]
    e = jnp.exp(jnp.abs(sdf) * neg_inv_beta)                 # f32, EUP slot
    out_ref[...] = (half_inv_beta * jnp.where(sdf >= 0, e, 2.0 - e)).astype(out_ref.dtype)


# ----------------------------------------------------------------------------- helpers

def _laplace_density_jnp(x, neg_inv_beta, half_inv_beta):
    """Plain-jnp fallback / tail path. Same math, same output dtype as the kernel."""
    e = jnp.exp(jnp.abs(x) * neg_inv_beta)
    return (half_inv_beta * jnp.where(x >= 0, e, 2.0 - e)).astype(x.dtype)


def _sublane_multiple(dtype):
    """Minimum sublane multiple for the second-to-last block dim: 8 f32, 16 bf16, 32 int8/fp8."""
    bits = jnp.dtype(dtype).itemsize * 8
    return max(8, 256 // bits)


def _vmem_capacity_bytes():
    """Physical per-core VMEM. Conservative fallback = 64 MiB (v7x-sized) if query fails."""
    try:
        info = pltpu.get_tpu_info()
        v = getattr(info, "vmem_capacity_bytes", None)
        if v:
            return int(v)
    except Exception:
        pass
    return 64 << 20


def _kernel_flat(x_flat, scalars, *, lane_width=None, block_rows=None, tile_bytes=None):
    """Run the Pallas kernel on a flat array whose size admits a legal (sublane,128)-aligned
    2-D tiling. Returns the flat output, or None if no such tiling exists (caller falls back)."""
    n = int(x_flat.size)
    dtype = x_flat.dtype
    itemsize = jnp.dtype(dtype).itemsize
    subl = _sublane_multiple(dtype)

    # Lane width: widest multiple of 128 that divides n (zero-copy reshape, unmasked vst).
    candidates = (int(lane_width),) if lane_width is not None else (1024, 512, 256, 128)
    W = None
    for cand in candidates:
        if cand >= 128 and cand % 128 == 0 and n % cand == 0 and (n // cand) >= subl:
            W = cand
            break
    if W is None:
        return None
    rows = n // W

    # Per-generation tile sizing: ~VMEM/8 per tile keeps 2 arrays x 2 buffers well inside VMEM.
    phys_vmem = _vmem_capacity_bytes()
    if tile_bytes is None:
        tile_bytes = max(2 << 20, min(16 << 20, phys_vmem // 8))
    tile_bytes = min(int(tile_bytes), phys_vmem // 8)

    if block_rows is None:
        tm = (tile_bytes // (W * itemsize)) // subl * subl
    else:
        tm = (int(block_rows) // subl) * subl
    # Round DOWN so every block fits inside the array; the last grid block may be partial.
    tm = max(subl, min(tm, (rows // subl) * subl))

    grid = (pl.cdiv(rows, tm),)
    resident = 4 * tm * W * itemsize                    # (in + out) x double buffer
    vmem_limit = max(32 << 20, min(phys_vmem * 3 // 4, resident + (8 << 20)))

    out = pl.pallas_call(
        _sdf_to_density_kernel,
        out_shape=jax.ShapeDtypeStruct((rows, W), dtype),
        grid_spec=pltpu.PrefetchScalarGridSpec(
            num_scalar_prefetch=1,                                  # (-1/beta, 0.5/beta) in SMEM
            grid=grid,
            in_specs=[pl.BlockSpec((tm, W), lambda i, s: (i, 0))],
            out_specs=pl.BlockSpec((tm, W), lambda i, s: (i, 0)),
        ),
        compiler_params=pltpu.CompilerParams(
            # NOTE(v7x): "parallel" lets the runtime shard the row axis across both
            # TensorCores; if xprof shows only one TC busy, switch to pltpu.CORE_PARALLEL.
            dimension_semantics=("parallel",),
            vmem_limit_bytes=int(vmem_limit),
        ),
        cost_estimate=pl.CostEstimate(
            flops=5 * n,
            transcendentals=n,
            bytes_accessed=2 * n * itemsize,
        ),
    )(scalars, x_flat.reshape(rows, W))

    return out.reshape(-1)


# ----------------------------------------------------------------------------- public wrapper

def sdf_to_density(sdf, beta_param, min_beta=0.01, *, min_kernel_bytes=1 << 20,
                   lane_width=None, block_rows=None, tile_bytes=None):
    """Elementwise SDF -> density (VolSDF-style Laplace CDF). Any input shape; same shape/dtype out."""
    orig_shape = sdf.shape
    itemsize = jnp.dtype(sdf.dtype).itemsize

    # O(1) parameter transform stays in plain JAX; alpha == 1/beta.
    beta = min_beta + jnp.abs(jnp.asarray(beta_param, jnp.float32)).reshape(())
    inv_beta = 1.0 / beta
    scalars = jnp.stack([-inv_beta, 0.5 * inv_beta]).astype(jnp.float32)   # SMEM prefetch (2,)

    x = sdf.reshape(-1)                 # free (no element reorder) for a contiguous array
    n = int(x.size)

    # Tiny inputs: launch + layout plumbing dominate; let XLA emit the fused elementwise op.
    if n == 0 or n * itemsize < min_kernel_bytes:
        return _laplace_density_jnp(sdf, scalars[0], scalars[1])

    # Fast path: n already tiles into a lane-dense slab -> zero-copy reshape, no pad, no slice.
    out = _kernel_flat(x, scalars, lane_width=lane_width,
                       block_rows=block_rows, tile_bytes=tile_bytes)
    if out is not None:
        return out.reshape(orig_shape)

    # Ragged size: kernel on the 128-aligned prefix, <128-element tail in plain jnp.
    n_main = (n // 128) * 128
    out_main = None
    if n_main:
        out_main = _kernel_flat(x[:n_main], scalars,
                                block_rows=block_rows, tile_bytes=tile_bytes)
    if out_main is None:
        return _laplace_density_jnp(sdf, scalars[0], scalars[1])
    if n_main == n:
        return out_main.reshape(orig_shape)
    out_tail = _laplace_density_jnp(x[n_main:], scalars[0], scalars[1])
    return jnp.concatenate([out_main, out_tail]).reshape(orig_shape)


# ----------------------------------------------------------------------------- reference & demo

def sdf_to_density_ref(sdf, beta_param, min_beta=0.01):
    beta = min_beta + jnp.abs(beta_param)
    alpha = 1.0 / beta
    return alpha * (0.5 + 0.5 * jnp.sign(sdf) * jnp.expm1(-jnp.abs(sdf) / beta))


if __name__ == "__main__":
    key = jax.random.PRNGKey(0)
    k1, k2, k3, k4, k5 = jax.random.split(key, 5)

    # Deterministic parameter matching nn.Parameter(torch.Tensor([init_beta])), init_beta=1.
    beta_param = jnp.array([1.0], dtype=jnp.float32)

    # 1) Ragged (N, 1) SDF sample batch -> aligned-prefix kernel + tiny jnp tail (no pad copy).
    sdf1 = jax.random.normal(k1, (2000, 1), dtype=jnp.float32) * 0.5
    out1 = jax.block_until_ready(sdf_to_density(sdf1, beta_param, min_kernel_bytes=0))
    ref1 = sdf_to_density_ref(sdf1, beta_param)
    assert out1.shape == sdf1.shape
    assert jnp.allclose(out1, ref1, atol=1e-5, rtol=1e-5), "mismatch vs reference (case 1)"

    # 2) Tiny arbitrary-rank input -> plain-jnp fallback path (no kernel launch).
    sdf2 = jax.random.normal(k2, (3, 5, 7), dtype=jnp.float32)
    out2 = jax.block_until_ready(sdf_to_density(sdf2, beta_param))
    ref2 = sdf_to_density_ref(sdf2, beta_param)
    assert out2.shape == sdf2.shape
    assert jnp.allclose(out2, ref2, atol=1e-5, rtol=1e-5), "mismatch vs reference (case 2)"

    # 3) Multi-block pipelined path with explicit small tiling (zero-copy reshape, >1 grid step).
    sdf3 = jax.random.normal(k3, (64, 128), dtype=jnp.float32)
    out3 = jax.block_until_ready(
        sdf_to_density(sdf3, beta_param, min_kernel_bytes=0, lane_width=128, block_rows=8))
    ref3 = sdf_to_density_ref(sdf3, beta_param)
    assert out3.shape == sdf3.shape
    assert jnp.allclose(out3, ref3, atol=1e-5, rtol=1e-5), "mismatch vs reference (case 3)"

    # 4) bf16 input -> (16,128)-aligned tiles, explicit output cast, half the HBM traffic.
    sdf4 = (jax.random.normal(k4, (128, 256), dtype=jnp.float32) * 0.5).astype(jnp.bfloat16)
    out4 = jax.block_until_ready(sdf_to_density(sdf4, beta_param, min_kernel_bytes=0))
    ref4 = sdf_to_density_ref(sdf4.astype(jnp.float32), beta_param)
    assert out4.shape == sdf4.shape and out4.dtype == jnp.bfloat16
    assert jnp.allclose(out4.astype(jnp.float32), ref4, atol=2e-2, rtol=2e-2), \
        "mismatch vs reference (case 4)"

    # 5) Mid-size aligned input -> natural zero-copy fast path (no forcing, no copies at all).
    sdf5 = jax.random.normal(k5, (512, 1024), dtype=jnp.float32)
    out5 = jax.block_until_ready(sdf_to_density(sdf5, beta_param))
    ref5 = sdf_to_density_ref(sdf5, beta_param)
    assert out5.shape == sdf5.shape
    assert jnp.allclose(out5, ref5, atol=1e-5, rtol=1e-5), "mismatch vs reference (case 5)"

    print("KERNEL_OK")
</pallas_src>

<mosaic_0001>
module attributes {stable_mosaic.version = 11 : i64} {
  func.func @_sdf_to_density_kernel(%arg0: i32, %arg1: memref<2xf32, #tpu.memory_space<smem>>, %arg2: memref<8x128xf32, #tpu.memory_space<vmem>>, %arg3: memref<8x128xf32, #tpu.memory_space<vmem>>) attributes {dimension_semantics = [#tpu.dimension_semantics<parallel>], iteration_bounds = array<i64: 2>, scalar_prefetch = 1 : i64, scratch_operands = 0 : i64, tpu.core_type = #tpu.core_type<tc>, window_params = [{transform_indices = @transform_0, window_bounds = array<i64: 8, 128>}, {transform_indices = @transform_1, window_bounds = array<i64: 8, 128>}]} {
    %c0 = arith.constant 0 : index
    %0 = memref.load %arg1[%c0] : memref<2xf32, #tpu.memory_space<smem>>
    %c1 = arith.constant 1 : index
    %1 = memref.load %arg1[%c1] : memref<2xf32, #tpu.memory_space<smem>>
    %c0_0 = arith.constant 0 : index
    %c0_1 = arith.constant 0 : index
    %2 = vector.load %arg2[%c0_0, %c0_1] : memref<8x128xf32, #tpu.memory_space<vmem>>, vector<8x128xf32>
    %3 = math.absf %2 : vector<8x128xf32>
    %4 = vector.broadcast %0 : f32 to vector<8x128xf32>
    %5 = arith.mulf %3, %4 : vector<8x128xf32>
    %6 = math.exp %5 : vector<8x128xf32>
    %cst = arith.constant 0.000000e+00 : f32
    %7 = vector.broadcast %cst : f32 to vector<8x128xf32>
    %8 = arith.cmpf oge, %2, %7 : vector<8x128xf32>
    %cst_2 = arith.constant 2.000000e+00 : f32
    %9 = vector.broadcast %cst_2 : f32 to vector<8x128xf32>
    %10 = arith.subf %9, %6 : vector<8x128xf32>
    %11 = arith.select %8, %6, %10 : vector<8x128xi1>, vector<8x128xf32>
    %12 = vector.broadcast %1 : f32 to vector<8x128xf32>
    %13 = arith.mulf %12, %11 : vector<8x128xf32>
    %c0_3 = arith.constant 0 : index
    %c0_4 = arith.constant 0 : index
    %14 = vector.load %arg3[%c0_3, %c0_4] : memref<8x128xf32, #tpu.memory_space<vmem>>, vector<8x128xf32>
    tpu.vector_store %arg3[%c0_3, %c0_4], %13 {strides = array<i32>} : memref<8x128xf32, #tpu.memory_space<vmem>>, vector<8x128xf32>,
    return
  }
  func.func @transform_0(%arg0: i32, %arg1: memref<2xf32, #tpu.memory_space<smem>>) -> (i32, i32) {
    %c0_i32 = arith.constant 0 : i32
    %c0_i32_0 = arith.constant 0 : i32
    return %arg0, %c0_i32 : i32, i32
  }
  func.func @transform_1(%arg0: i32, %arg1: memref<2xf32, #tpu.memory_space<smem>>) -> (i32, i32) {
    %c0_i32 = arith.constant 0 : i32
    %c0_i32_0 = arith.constant 0 : i32
    return %arg0, %c0_i32 : i32, i32
  }
}

</mosaic_0001>

<bundles_post_ra>
// kernel: tpu_custom_call.1
= control target key start
LH: loop header
LB: loop body
LE: loop exit
PB: predicated region body
PF: predicated region fallthrough
CT: control target
= control target key end

     0   :  { %s417_s12 = smov [#allocation3]   ;;  %s563_s0 = inlined_call_operand.hbm [shape: f32[2], index: 0, kind: input, shape index: {}]   ;;  %s564_s1 = inlined_call_operand.hbm [shape: f32[15,128], index: 1, kind: input, shape index: {}]   ;;  %s565_s2 = inlined_call_operand.hbm [shape: f32[15,128], index: 2, kind: output, shape index: {}]  }
   0x1   :  { %s8_s11 = sshll.u32 %s563_s0, 4  ;;  %s9_s11 = int_to_ptr.hbm [resolvable:$true] %s8_s11 }
   0x2   :  { %11 = dma.hbm_to_smem %s9_s11, 16, %s417_s12, [#allocation2] }
   0x3   :  { %391 = dma.done.wait [#allocation2], 16 }
   0x4   :  { %392 = vsyncadd [#allocation2], 4294967280 }
   0x5   :  { %14 = sfence }
   0x6   :  { %15 = vsyncpa [#allocation5], 0 }
   0x7   :  { %17 = vsyncpa [#allocation5 + $0x1], 0 }
   0x8   :  { %18 = vsyncpa [#allocation6], 0 }
   0x9   :  { %20 = vsyncpa [#allocation6 + $0x1], 0  ;;  %s436_s13 = smov 0   ;;  %s438_s14 = smov 0  }
   0xa   :  { %s440_s15 = smov 0   ;;  %s442_s16 = smov 0  }
   0xb LB: > { %s457_s0 = sadd.s32 4294967295, %s415_s16   ;;  %s243_s17 = sadd.s32 4294967294, %s415_s16   ;;  %s415_s16 = sphi %s442_s16, %s575_s16   ;;  %s411_s15 = sphi %s440_s15, %s574_s15   ;;  %s407_s14 = sphi %s438_s14, %s573_s14   ;;  %s403_s13 = sphi %s436_s13, %s572_s13  }
   0xc   : > { %s461_s18 = sadd.s32 1, %s415_s16   ;;  %s33_s19 = sadd.s32 1, %s411_s15 }
   0xd   : > { %s30_s20 = ssub.s32 %s415_s16, %s461_s18  ;;  %p40_p0 = scmp.ne.s32.totalorder %s411_s15, %s407_s14 }
   0xe   : > { %p31_p1 = scmp.eq.s32.totalorder %s30_s20, 0  ;;  %p41_p2 = scmp.eq.s32.totalorder %s415_s16, 0 }
   0xf   : > { %p46_p3 = scmp.ne.s32.totalorder %s407_s14, %s403_s13  ;;  %p47_p4 = scmp.eq.s32.totalorder %s457_s0, 0 }
  0x10   : > { %s473_s21 = scalar_select %p31_p1, %s411_s15, %s33_s19  }
  0x11   : > { %p475_p5 = por %p41_p2, %p40_p0  ;;  %p479_p6 = por %p47_p4, %p46_p3 }
  0x12   : > { %p70_p7 = scmp.eq.s32.totalorder %s457_s0, 1  ;;  %p76_p8 = scmp.eq.s32.totalorder %s243_s17, 1 }
  0x13   : > { %p268_p10 = scmp.lt.s32.totalorder %s415_s16, 2  ;;  %s96_s26 = sand.u32 1, %s411_s15  }
  0x14   : > { %p486_p11 = por %p70_p7, %p40_p0  ;;  %p490_p12 = por %p76_p8, %p46_p3 }
  0x15   : > { %s247_s27 = sshll.u32 %s415_s16, 3  ;;  %s246_s28 = sshll.u32 %s96_s26, 3 }
  0x16   : > { %s104_s3 = scalar_lea.hbm %s564_s1, %s247_s27  ;;  %s100_s5 = scalar_lea.vmem [#allocation4], %s246_s28 }
  0x17   : > { %s106_s4 = sshll.u32 %s104_s3, 4  ;;  %s108_s6 = sshll.u32 %s100_s5, 4  ;;  %s107_s4 = int_to_ptr.hbm [resolvable:$true] %s106_s4  ;;  %s109_s6 = int_to_ptr.vmem [resolvable:$true] %s108_s6 }
  0x18   : > { %p501_p13 = pnand %p268_p10, %p475_p5  ;;  %p248_p0 = scmp.ge.s32.totalorder %s415_s16, 1 }
  0x19   : > { %p113_p1 = scmp.lt.s32.totalorder %s415_s16, 3  ;;  %s97_s8 = scalar_lea.sflag [#allocation5], %s96_s26 }
  0x1a   : > { %s317_s9 = sshra.s32 %s107_s4, 4  ;;  %p321_p3 = pneg %p501_p13  ;;  %s318_s9 = int_to_ptr.hbm [resolvable:$true] %s317_s9 }
  0x1b   : > { %s319_s10 = scalar_lea.hbm %s318_s9, 8  ;;  %s324_s17 = scalar_lea.hbm %s564_s1, 16 }
  0x1c   : > { %p320_p2 = scmp.ne.s32.totalorder %s318_s9, %s319_s10  ;;  %p325_p5 = scmp.lt.s32.totalorder %s318_s9, %s564_s1 }
  0x1d   : > { %p326_p8 = scmp.lt.s32.totalorder %s324_s17, %s319_s10 }
  0x1e   : > { %p322_p4 = pnand %p321_p3, %p320_p2 }
  0x1f   : > { %p327_p10 = por %p326_p8, %p325_p5 }
  0x20   : > { %p323_p7 = pneg %p322_p4 }
  0x22   : > { %p328_p9 = pnand %p327_p10, %p323_p7 }
  0x24   : > { %331 = shalt.err (!%p328_p9)
}
  0x25   : > { %263 = dma.hbm_to_vmem [thread:$0]  (!%p501_p13), %s107_s4, 128, %s109_s6, %s97_s8  }
  0x26   : > { %p114_p2 = pnand %p248_p0, %p113_p1 }
  0x27   : > { %s522_s22 = sand.u32 (!%p114_p2), 1, %s407_s14  }
  0x28   : > { %117 = sbr.rel (%p114_p2) target bundleno = 72 (0x48), region = 24  ;;  %s249_s26 = sshll.u32 (!%p114_p2), %s522_s22, 3 }
  0x29   : > { %s120_s27 = scalar_lea.sflag (!%p114_p2), [#allocation5], %s522_s22  ;;  %s123_s28 = scalar_lea.vmem (!%p114_p2), [#allocation4], %s249_s26 }
  0x2d   : > { %394 = dma.done.wait (%p479_p6), %s120_s27, 128  }
  0x2e   : > { %396 = vsyncadd (%p479_p6), %s120_s27, 4294967168  ;;  %s143_s29 = sld [smem:[#allocation3]]  ;;  %v145_v0 = vld [vmem:[%s123_s28] sm:$0xff]  ;;  %s253_s3 = sshll.u32 %s457_s0, 3 }
  0x2f   : > { %v146_v2 = vand.u32 2147483647, %v145_v0  ;;  %s251_s30 = sld [smem:[#allocation3 + $0x1]]  ;;  %s168_s6 = scalar_lea.hbm %s565_s2, %s253_s3  ;;  %vm151_vm0 = vcmp.ge.f32.partialorder %v145_v0, 0.0 }
  0x30   : > { %s142_s23 = scalar_lea.vmem [#allocation7], %s249_s26  ;;  %s172_s8 = sshll.u32 %s168_s6, 4  ;;  %s173_s8 = int_to_ptr.hbm [resolvable:$true] %s172_s8 }
  0x31   : > { %s170_s7 = sshll.u32 %s142_s23, 4  ;;  %s158_s9 = scalar_lea.sflag [#allocation6], %s522_s22  ;;  %s171_s7 = int_to_ptr.vmem [resolvable:$true] %s170_s7 }
  0x32   : > { %s361_s10 = sshra.s32 %s173_s8, 4  ;;  %s367_s17 = scalar_lea.hbm %s565_s2, 16  ;;  %s362_s10 = int_to_ptr.hbm [resolvable:$true] %s361_s10 }
  0x33   : > { %s363_s0 = scalar_lea.hbm %s362_s10, 8  ;;  %p368_p0 = scmp.lt.s32.totalorder %s362_s10, %s565_s2 }
  0x34   : > { %v147_v1 = vstv %s143_s29  ;;  %p364_p6 = scmp.ne.s32.totalorder %s362_s10, %s363_s0  ;;  %p369_p1 = scmp.lt.s32.totalorder %s367_s17, %s363_s0 }
  0x35   : > { %v148_v3 = vmul.f32 %v147_v1, %v146_v2  ;;  %v154_v7 = vstv %s251_s30 }
  0x36   : > { %p365_p9 = pnand %p364_p6, %p486_p11  ;;  %p370_p3 = por %p369_p1, %p368_p0 }
  0x37   : > { %v149_v4 = vmul.f32 1.442695, %v148_v3 }
  0x38   : > { %p366_p13 = pneg %p365_p9 }
  0x39   : > { %303 = vpow2.f32 %v149_v4 }
  0x3a   : > { %p371_p4 = pnand %p370_p3, %p366_p13 }
  0x3f   : > { %v304_v5 = vpop.eup %303 }
  0x40   : > { %v152_v6 = vsub.f32 2.0, %v304_v5 }
  0x42   : > { %v153_v8 = vsel %vm151_vm0, %v304_v5, %v152_v6 }
  0x43   : > { %v155_v9 = vmul.f32 %v154_v7, %v153_v8 }
  0x45   : > { %156 = vst [vmem:[%s142_s23] sm:$0xff] %v155_v9 }
  0x46   : > { %374 = shalt.err (!%p371_p4)
}
  0x47   : > { %258 = dma.vmem_to_hbm [thread:$0]  (%p486_p11), %s171_s7, 128, %s173_s8, %s158_s9  }
  0x48 PF: > { %s184_s22 = sand.u32 1, %s403_s13   ;;  %p571_p7 = scmp.ge.s32.totalorder %s415_s16, 2 }
  0x49   : > { %s185_s26 = scalar_lea.sflag [#allocation6], %s184_s22 }
  0x4a   : > { %p265_p5 = pnand %p571_p7, %p490_p12 }
  0x4c   : > { %p266_p8 = pneg %p265_p5 }
  0x4e   : > { %398 = dma.done.wait (%p266_p8), %s185_s26, 128  }
  0x4f   : > { %400 = vsyncadd (%p266_p8), %s185_s26, 4294967168  ;;  %p23_p10 = scmp.ge.s32.totalorder %s461_s18, 4   ;;  %s572_s13 = smov %s407_s14 }
  0x50   : > { %s573_s14 = smov %s411_s15  ;;  %s574_s15 = smov %s473_s21 }
  0x51   : > { %s575_s16 = smov %s461_s18  ;;  %25 = sbr.rel (!%p23_p10) target bundleno = 11 (0xb), region = 69 }
  0x56   :  { %191 = vsyncpa [#allocation5], 1 }
  0x57   :  { %193 = vsyncpa [#allocation5 + $0x1], 1 }
  0x58   :  { %194 = vsyncpa [#allocation6], 1 }
  0x59   :  { %196 = vsyncpa [#allocation6 + $0x1], 1 }

</bundles_post_ra>
